<compile_context>
chip_gen: v7x
topology: tpu7x:2x2x1
jax: 0.10.0
libtpu: 0.0.40
codegen_flags: <defaults>
</compile_context>

<pallas_src>
import functools
import math

import jax
import jax.numpy as jnp
from jax import lax
from jax.experimental import pallas as pl
from jax.experimental.pallas import tpu as pltpu


def _self_attention_kernel(x_ref, wq_ref, bq_ref, wk_ref, bk_ref, wv_ref, bv_ref,
                           *refs, mm_dtype, tiles_per_split, with_attn):
    # x_ref:   (1, S, D_in)  full sequence of the current batch element
    # w*_ref:  (D_in, H)     pre-transposed Linear weights
    # b*_ref:  (1, H)        biases
    # outputs: out (1, TQ, H) and (optionally) attn (1, TQ, S)
    # scratch: k_sc / v_sc (S, H) in mm_dtype, valid for the whole batch element
    if with_attn:
        out_ref, attn_ref, k_sc, v_sc = refs
    else:
        out_ref, k_sc, v_sc = refs
        attn_ref = None

    qi = pl.program_id(2)
    tq = out_ref.shape[1]
    hidden = out_ref.shape[2]
    scale = 1.0 / math.sqrt(hidden)

    # K/V projection for the full sequence, once per (batch, core-split) pair.
    # The query-tile grid axis is "arbitrary" (sequential), so the scratch cache
    # stays valid for every subsequent query tile of this batch element.
    @pl.when(qi == 0)
    def _():
        x = x_ref[0].astype(mm_dtype)                                   # (S, D_in)
        k = jnp.dot(x, wk_ref[...].astype(mm_dtype),
                    preferred_element_type=jnp.float32) + bk_ref[...]
        v = jnp.dot(x, wv_ref[...].astype(mm_dtype),
                    preferred_element_type=jnp.float32) + bv_ref[...]
        k_sc[...] = k.astype(k_sc.dtype)   # stored in MXU dtype: cast once,
        v_sc[...] = v.astype(v_sc.dtype)   # not once per query tile

    # Q projection only for the current query tile.
    tile = pl.program_id(1) * tiles_per_split + qi
    q_start = pl.multiple_of(tile * tq, tq)
    x_tile = x_ref[0, pl.ds(q_start, tq), :].astype(mm_dtype)           # (TQ, D_in)
    q = jnp.dot(x_tile, wq_ref[...].astype(mm_dtype),
                preferred_element_type=jnp.float32) + bq_ref[...]
    q = (q * scale).astype(mm_dtype)          # fold 1/sqrt(H) into q (TQ*H muls)

    # scores = q @ k^T without materializing a transpose: contract last dims.
    scores = lax.dot_general(q, k_sc[...], (((1,), (1,)), ((), ())),
                             preferred_element_type=jnp.float32)        # (TQ, S)

    # Numerically stable softmax in f32; normalization via the EUP approximate
    # reciprocal + multiply instead of a broadcast divide over (TQ, S).
    scores_max = jnp.max(scores, axis=-1, keepdims=True)
    exp_scores = jnp.exp(scores - scores_max)
    denom = jnp.sum(exp_scores, axis=-1, keepdims=True)
    attn = exp_scores * pl.reciprocal(denom, approx=True)               # (TQ, S) f32

    attn_mm = attn.astype(mm_dtype)
    weighted = jnp.dot(attn_mm, v_sc[...],
                       preferred_element_type=jnp.float32)              # (TQ, H)

    out_ref[0] = weighted.astype(out_ref.dtype)
    if attn_ref is not None:
        if attn_ref.dtype == mm_dtype:
            attn_ref[0] = attn_mm          # reuse the cast made for the MXU operand
        else:
            attn_ref[0] = attn.astype(attn_ref.dtype)


def _vmem_capacity_bytes():
    """Physical VMEM of the current chip; conservative fallback = v7x 64 MiB/TC."""
    default = 64 * 2 ** 20
    try:
        info = pltpu.get_tpu_info()
    except Exception:
        return default
    for name in ("vmem_capacity_bytes", "vmem_size_bytes", "vmem_bytes"):
        cap = getattr(info, name, None)
        if cap:
            return int(cap)
    return default


def _min_tile_rows(*dtypes):
    # Native sublane tile: 8 rows for 32-bit, 16 for 16-bit, 32 for 8-bit dtypes.
    return max(8 * max(1, 4 // jnp.dtype(d).itemsize) for d in dtypes)


def _vmem_usage(S, D_in, H, x_isz, mm_isz, out_isz, attn_isz, with_attn):
    """(fixed_bytes, per_query_row_bytes) of resident VMEM for this layout."""
    fixed = (2 * S * D_in * x_isz                        # (1,S,D_in) x block, 2 buffers
             + 2 * 3 * (D_in * H + H) * x_isz            # q/k/v weights + biases, 2 buf
             + 2 * S * H * mm_isz)                       # K/V scratch (mm_dtype)
    per_row = (2 * H * out_isz                           # output tile, 2 buffers
               + (2 * S * attn_isz if with_attn else 0)  # attention tile, 2 buffers
               + 4 * S * 4                               # f32 scores/exp/attn temps
               + 3 * H * 4)                              # q tile / weighted temps
    return fixed, per_row


def _choose_tq(S, D_in, H, x_isz, mm_isz, out_isz, attn_isz, with_attn,
               min_rows, vmem_cap):
    """Largest aligned query tile whose working set fits ~85% of physical VMEM."""
    budget = int(vmem_cap * 0.85)
    fixed, per_row = _vmem_usage(S, D_in, H, x_isz, mm_isz, out_isz, attn_isz,
                                 with_attn)
    avail = budget - fixed
    if avail <= per_row * min_rows:
        # TODO(synk): for very large S*D_in the resident x block / projection
        # should be chunked over D_in with an extra grid axis; fall back to the
        # smallest aligned tile here instead of failing outright.
        avail = per_row * min_rows
    tq_max = max(min_rows, avail // per_row)
    if S <= tq_max:
        return S
    best = None
    t = min_rows
    while t <= tq_max:
        if S % t == 0:
            best = t
        t += min_rows
    return best if best is not None else S   # irregular S: fall back to untiled


def self_attention(x, wq, bq, wk, bk, wv, bv, *, tq=None, q_split=None,
                   mxu_dtype=jnp.bfloat16, attn_dtype=None, return_attn=True):
    """x: (B, S, D_in); w*: (D_in, H) (pre-transposed vs. PyTorch); b*: (H,).

    Returns (weighted_sum (B,S,H), attention_weights (B,S,S)) like the PyTorch
    module, or only the weighted sum when return_attn=False.

    mxu_dtype: dtype of the MXU operands (default bf16, the native MXU dtype on
    v5e/v6e/v7x); accumulation / softmax stay f32.  Pass jnp.float32 for exact
    f32 matmuls.  attn_dtype (default x.dtype): pass bf16 to halve the O(S^2)
    attention writeback on memory-bound shapes.
    """
    B, S, D_in = x.shape
    H = wq.shape[1]
    out_dtype = x.dtype
    attn_dtype = jnp.dtype(attn_dtype or x.dtype)
    mm_dtype = jnp.dtype(mxu_dtype or x.dtype)

    x_isz = jnp.dtype(x.dtype).itemsize
    mm_isz = mm_dtype.itemsize
    out_isz = jnp.dtype(out_dtype).itemsize
    attn_isz = attn_dtype.itemsize

    min_rows = _min_tile_rows(x.dtype, out_dtype, attn_dtype)
    vmem_cap = _vmem_capacity_bytes()

    if tq is None:
        tq = _choose_tq(S, D_in, H, x_isz, mm_isz, out_isz, attn_isz, return_attn,
                        min_rows, vmem_cap)
        # With a single batch element keep >= 2 query tiles so the tile axis can
        # still be core-split across a megacore (v7x) instead of idling a core.
        if B == 1 and tq == S and S % (2 * min_rows) == 0:
            tq = S // 2
    assert S % tq == 0 and (tq == S or tq % min_rows == 0), (S, tq, min_rows)

    n_tiles = S // tq
    if q_split is None:
        q_split = 2 if (B == 1 and n_tiles >= 2 and n_tiles % 2 == 0) else 1
    assert n_tiles % q_split == 0, (n_tiles, q_split)
    tiles_per_split = n_tiles // q_split

    bq2 = bq.reshape(1, H)
    bk2 = bk.reshape(1, H)
    bv2 = bv.reshape(1, H)

    kernel = functools.partial(_self_attention_kernel, mm_dtype=mm_dtype,
                               tiles_per_split=tiles_per_split,
                               with_attn=return_attn)

    # Advisory cost estimate for XLA scheduling around the custom call.
    flops = 2 * B * S * (3 * D_in * H) + 4 * B * S * S * H
    bytes_accessed = ((B * S * D_in + 3 * (D_in * H + H)) * x_isz
                      + B * S * H * out_isz
                      + (B * S * S * attn_isz if return_attn else 0))
    cost = pl.CostEstimate(flops=int(flops), transcendentals=int(B * S * S),
                           bytes_accessed=int(bytes_accessed))

    # Chip-aware VMEM limit: same accounting as the tile chooser, with headroom,
    # capped below the physical VMEM of the current generation.
    fixed, per_row = _vmem_usage(S, D_in, H, x_isz, mm_isz, out_isz, attn_isz,
                                 return_attn)
    vmem_est = fixed + per_row * tq
    vmem_limit = int(min(int(vmem_cap * 0.9), max(2 * vmem_est, 32 * 2 ** 20)))

    w_spec = pl.BlockSpec((D_in, H), lambda b, c, q: (0, 0))   # re-fetched never:
    b_spec = pl.BlockSpec((1, H), lambda b, c, q: (0, 0))      # constant block idx

    out_specs = [pl.BlockSpec((1, tq, H),
                              lambda b, c, q: (b, c * tiles_per_split + q, 0))]
    out_shapes = [jax.ShapeDtypeStruct((B, S, H), out_dtype)]
    if return_attn:
        out_specs.append(pl.BlockSpec((1, tq, S),
                                      lambda b, c, q: (b, c * tiles_per_split + q, 0)))
        out_shapes.append(jax.ShapeDtypeStruct((B, S, S), attn_dtype))

    results = pl.pallas_call(
        kernel,
        out_shape=tuple(out_shapes),
        grid_spec=pltpu.PrefetchScalarGridSpec(
            num_scalar_prefetch=0,
            grid=(B, q_split, tiles_per_split),
            in_specs=[
                pl.BlockSpec((1, S, D_in), lambda b, c, q: (b, 0, 0)),  # whole sequence,
                w_spec, b_spec,                                          # re-fetched only
                w_spec, b_spec,                                          # on batch change
                w_spec, b_spec,
            ],
            out_specs=tuple(out_specs),
            scratch_shapes=[
                pltpu.VMEM((S, H), mm_dtype),   # K cache (MXU dtype, cast once)
                pltpu.VMEM((S, H), mm_dtype),   # V cache
            ],
        ),
        compiler_params=pltpu.CompilerParams(
            # Batch and query core-split axes parallel (megacore sharding); the
            # query-tile axis must stay sequential so the qi==0 K/V cache stays
            # valid for the remaining tiles of the same (batch, split) pair.
            dimension_semantics=("parallel", "parallel", "arbitrary"),
            vmem_limit_bytes=vmem_limit,
        ),
        cost_estimate=cost,
    )(x, wq, bq2, wk, bk2, wv, bv2)

    if return_attn:
        return results
    return results[0] if isinstance(results, (tuple, list)) else results


def _reference(x, wq, bq, wk, bk, wv, bv):
    q = jnp.einsum("bsd,dh->bsh", x, wq) + bq
    k = jnp.einsum("bsd,dh->bsh", x, wk) + bk
    v = jnp.einsum("bsd,dh->bsh", x, wv) + bv
    scale = 1.0 / math.sqrt(q.shape[-1])
    scores = jnp.einsum("bqh,bkh->bqk", q, k) * scale
    attn = jax.nn.softmax(scores, axis=-1)
    out = jnp.einsum("bqk,bkh->bqh", attn, v)
    return out, attn


if __name__ == "__main__":
    def make_inputs(B, S, D_in, H, seed=0):
        key = jax.random.PRNGKey(seed)
        kx, kq, kbq, kk, kbk, kv, kbv = jax.random.split(key, 7)
        x = jax.random.normal(kx, (B, S, D_in), dtype=jnp.float32)
        init = 1.0 / math.sqrt(D_in)
        wq = jax.random.uniform(kq, (D_in, H), jnp.float32, -init, init)
        bq = jax.random.uniform(kbq, (H,), jnp.float32, -init, init)
        wk = jax.random.uniform(kk, (D_in, H), jnp.float32, -init, init)
        bk = jax.random.uniform(kbk, (H,), jnp.float32, -init, init)
        wv = jax.random.uniform(kv, (D_in, H), jnp.float32, -init, init)
        bv = jax.random.uniform(kbv, (H,), jnp.float32, -init, init)
        return x, wq, bq, wk, bk, wv, bv

    def run_case(B, S, D_in, H, tq=None, mxu_dtype=jnp.bfloat16, tol=3e-2):
        args = make_inputs(B, S, D_in, H)
        out, attn = self_attention(*args, tq=tq, mxu_dtype=mxu_dtype)
        jax.block_until_ready((out, attn))
        out_ref, attn_ref = _reference(*args)
        assert out.shape == (B, S, H) and attn.shape == (B, S, S)
        # Tolerances: bf16 MXU operands + EUP approximate reciprocal; f32 path
        # is limited only by the approximate reciprocal (~1e-4 relative).
        assert jnp.allclose(out, out_ref, atol=tol, rtol=tol), \
            float(jnp.max(jnp.abs(out - out_ref)))
        assert jnp.allclose(attn, attn_ref, atol=tol, rtol=tol), \
            float(jnp.max(jnp.abs(attn - attn_ref)))
        assert jnp.allclose(jnp.sum(attn, axis=-1), 1.0, atol=1e-2)
        return args, out

    # Small shapes consistent with the module: batch=2, seq=8, input_dim=16, hidden=32.
    # Default config: bf16 MXU operands, f32 accumulation / outputs.
    run_case(B=2, S=8, D_in=16, H=32)

    # Query-tiled path (4 query tiles per batch element, cached K/V), exact f32 MXU.
    run_case(B=2, S=64, D_in=16, H=32, tq=16, mxu_dtype=jnp.float32, tol=5e-3)

    # B=1: the query-tile axis is core-split (q_split=2) so a v7x megacore does
    # not idle a core; also exercise the attn-less fast path.
    args, out_full = run_case(B=1, S=64, D_in=16, H=32, tq=16)
    out_only = self_attention(*args, tq=16, return_attn=False)
    jax.block_until_ready(out_only)
    assert out_only.shape == out_full.shape
    assert jnp.allclose(out_only, out_full, atol=1e-3, rtol=1e-3)

    print("KERNEL_OK")
</pallas_src>

<mosaic_0001>
module attributes {stable_mosaic.version = 11 : i64} {
  func.func @_self_attention_kernel(%arg0: i32, %arg1: i32, %arg2: i32, %arg3: memref<1x8x16xf32, #tpu.memory_space<vmem>>, %arg4: memref<16x32xf32, #tpu.memory_space<vmem>>, %arg5: memref<1x32xf32, #tpu.memory_space<vmem>>, %arg6: memref<16x32xf32, #tpu.memory_space<vmem>>, %arg7: memref<1x32xf32, #tpu.memory_space<vmem>>, %arg8: memref<16x32xf32, #tpu.memory_space<vmem>>, %arg9: memref<1x32xf32, #tpu.memory_space<vmem>>, %arg10: memref<1x8x32xf32, #tpu.memory_space<vmem>>, %arg11: memref<1x8x8xf32, #tpu.memory_space<vmem>>, %arg12: memref<8x32xbf16, #tpu.memory_space<vmem>>, %arg13: memref<8x32xbf16, #tpu.memory_space<vmem>>) attributes {dimension_semantics = [#tpu.dimension_semantics<parallel>, #tpu.dimension_semantics<parallel>, #tpu.dimension_semantics<arbitrary>], iteration_bounds = array<i64: 2, 1, 1>, scalar_prefetch = 0 : i64, scratch_operands = 2 : i64, tpu.core_type = #tpu.core_type<tc>, window_params = [{transform_indices = @transform_0, window_bounds = array<i64: 1, 8, 16>}, {pipeline_mode = #tpu.pipeline_mode<synchronous>, transform_indices = @transform_1, window_bounds = array<i64: 16, 32>}, {pipeline_mode = #tpu.pipeline_mode<synchronous>, transform_indices = @transform_2, window_bounds = array<i64: 1, 32>}, {pipeline_mode = #tpu.pipeline_mode<synchronous>, transform_indices = @transform_3, window_bounds = array<i64: 16, 32>}, {pipeline_mode = #tpu.pipeline_mode<synchronous>, transform_indices = @transform_4, window_bounds = array<i64: 1, 32>}, {pipeline_mode = #tpu.pipeline_mode<synchronous>, transform_indices = @transform_5, window_bounds = array<i64: 16, 32>}, {pipeline_mode = #tpu.pipeline_mode<synchronous>, transform_indices = @transform_6, window_bounds = array<i64: 1, 32>}, {transform_indices = @transform_7, window_bounds = array<i64: 1, 8, 32>}, {transform_indices = @transform_8, window_bounds = array<i64: 1, 8, 8>}]} {
    %c0_i32 = arith.constant 0 : i32
    %0 = arith.cmpi eq, %arg2, %c0_i32 : i32
    %1 = arith.extui %0 : i1 to i32
    %c0_i32_0 = arith.constant 0 : i32
    %2 = arith.cmpi ne, %1, %c0_i32_0 : i32
    scf.if %2 {
      %c0_21 = arith.constant 0 : index
      %c0_22 = arith.constant 0 : index
      %c0_23 = arith.constant 0 : index
      %41 = vector.load %arg3[%c0_21, %c0_22, %c0_23] : memref<1x8x16xf32, #tpu.memory_space<vmem>>, vector<1x8x16xf32>
      %42 = vector.shape_cast %41 : vector<1x8x16xf32> to vector<8x16xf32>
      %43 = arith.truncf %42 : vector<8x16xf32> to vector<8x16xbf16>
      %c0_24 = arith.constant 0 : index
      %c0_25 = arith.constant 0 : index
      %44 = vector.load %arg6[%c0_24, %c0_25] : memref<16x32xf32, #tpu.memory_space<vmem>>, vector<16x32xf32>
      %45 = arith.truncf %44 : vector<16x32xf32> to vector<16x32xbf16>
      %cst_26 = arith.constant dense<0.000000e+00> : vector<8x32xf32>
      %46 = tpu.matmul %43, %45, %cst_26 {dimension_numbers = #tpu.dot_dimension_numbers<[1], [0], [0], [1], [0, 0, 1, 1], [], []>} : vector<8x16xbf16>, vector<16x32xbf16>, vector<8x32xf32> -> vector<8x32xf32>
      %c0_27 = arith.constant 0 : index
      %c0_28 = arith.constant 0 : index
      %47 = vector.load %arg7[%c0_27, %c0_28] : memref<1x32xf32, #tpu.memory_space<vmem>>, vector<1x32xf32>
      %48 = vector.broadcast %47 : vector<1x32xf32> to vector<8x32xf32>
      %49 = arith.addf %46, %48 : vector<8x32xf32>
      %c0_29 = arith.constant 0 : index
      %c0_30 = arith.constant 0 : index
      %50 = vector.load %arg8[%c0_29, %c0_30] : memref<16x32xf32, #tpu.memory_space<vmem>>, vector<16x32xf32>
      %51 = arith.truncf %50 : vector<16x32xf32> to vector<16x32xbf16>
      %cst_31 = arith.constant dense<0.000000e+00> : vector<8x32xf32>
      %52 = tpu.matmul %43, %51, %cst_31 {dimension_numbers = #tpu.dot_dimension_numbers<[1], [0], [0], [1], [0, 0, 1, 1], [], []>} : vector<8x16xbf16>, vector<16x32xbf16>, vector<8x32xf32> -> vector<8x32xf32>
      %c0_32 = arith.constant 0 : index
      %c0_33 = arith.constant 0 : index
      %53 = vector.load %arg9[%c0_32, %c0_33] : memref<1x32xf32, #tpu.memory_space<vmem>>, vector<1x32xf32>
      %54 = vector.broadcast %53 : vector<1x32xf32> to vector<8x32xf32>
      %55 = arith.addf %52, %54 : vector<8x32xf32>
      %56 = arith.truncf %49 : vector<8x32xf32> to vector<8x32xbf16>
      %c0_34 = arith.constant 0 : index
      %c0_35 = arith.constant 0 : index
      %57 = vector.load %arg12[%c0_34, %c0_35] : memref<8x32xbf16, #tpu.memory_space<vmem>>, vector<8x32xbf16>
      tpu.vector_store %arg12[%c0_34, %c0_35], %56 {strides = array<i32>} : memref<8x32xbf16, #tpu.memory_space<vmem>>, vector<8x32xbf16>,
      %58 = arith.truncf %55 : vector<8x32xf32> to vector<8x32xbf16>
      %c0_36 = arith.constant 0 : index
      %c0_37 = arith.constant 0 : index
      %59 = vector.load %arg13[%c0_36, %c0_37] : memref<8x32xbf16, #tpu.memory_space<vmem>>, vector<8x32xbf16>
      tpu.vector_store %arg13[%c0_36, %c0_37], %58 {strides = array<i32>} : memref<8x32xbf16, #tpu.memory_space<vmem>>, vector<8x32xbf16>,
    } else {
    }
    %c1_i32 = arith.constant 1 : i32
    %3 = arith.muli %arg1, %c1_i32 : i32
    %4 = arith.addi %3, %arg2 : i32
    %c8_i32 = arith.constant 8 : i32
    %5 = arith.muli %4, %c8_i32 : i32
    %6 = tpu.assume_multiple %5, 8 : i32
    %c0 = arith.constant 0 : index
    %7 = arith.index_cast %6 : i32 to index
    %c0_1 = arith.constant 0 : index
    %8 = vector.load %arg3[%c0, %7, %c0_1] : memref<1x8x16xf32, #tpu.memory_space<vmem>>, vector<1x8x16xf32>
    %9 = vector.shape_cast %8 : vector<1x8x16xf32> to vector<8x16xf32>
    %10 = arith.truncf %9 : vector<8x16xf32> to vector<8x16xbf16>
    %c0_2 = arith.constant 0 : index
    %c0_3 = arith.constant 0 : index
    %11 = vector.load %arg4[%c0_2, %c0_3] : memref<16x32xf32, #tpu.memory_space<vmem>>, vector<16x32xf32>
    %12 = arith.truncf %11 : vector<16x32xf32> to vector<16x32xbf16>
    %cst = arith.constant dense<0.000000e+00> : vector<8x32xf32>
    %13 = tpu.matmul %10, %12, %cst {dimension_numbers = #tpu.dot_dimension_numbers<[1], [0], [0], [1], [0, 0, 1, 1], [], []>} : vector<8x16xbf16>, vector<16x32xbf16>, vector<8x32xf32> -> vector<8x32xf32>
    %c0_4 = arith.constant 0 : index
    %c0_5 = arith.constant 0 : index
    %14 = vector.load %arg5[%c0_4, %c0_5] : memref<1x32xf32, #tpu.memory_space<vmem>>, vector<1x32xf32>
    %15 = vector.broadcast %14 : vector<1x32xf32> to vector<8x32xf32>
    %16 = arith.addf %13, %15 : vector<8x32xf32>
    %cst_6 = arith.constant 0.176776692 : f32
    %17 = vector.broadcast %cst_6 : f32 to vector<8x32xf32>
    %18 = arith.mulf %16, %17 : vector<8x32xf32>
    %19 = arith.truncf %18 : vector<8x32xf32> to vector<8x32xbf16>
    %c0_7 = arith.constant 0 : index
    %c0_8 = arith.constant 0 : index
    %20 = vector.load %arg12[%c0_7, %c0_8] : memref<8x32xbf16, #tpu.memory_space<vmem>>, vector<8x32xbf16>
    %cst_9 = arith.constant dense<0.000000e+00> : vector<8x8xf32>
    %21 = tpu.matmul %19, %20, %cst_9 {dimension_numbers = #tpu.dot_dimension_numbers<[1], [1], [0], [0], [0, 0, 1, 0], [], []>} : vector<8x32xbf16>, vector<8x32xbf16>, vector<8x8xf32> -> vector<8x8xf32>
    %cst_10 = arith.constant dense<0xFF800000> : vector<8xf32>
    %22 = vector.multi_reduction <maximumf>, %21, %cst_10 [1] : vector<8x8xf32> to vector<8xf32>
    %23 = vector.shape_cast %22 : vector<8xf32> to vector<8x1xf32>
    %24 = vector.broadcast %23 : vector<8x1xf32> to vector<8x8xf32>
    %25 = arith.subf %21, %24 : vector<8x8xf32>
    %26 = math.exp %25 : vector<8x8xf32>
    %cst_11 = arith.constant dense<0.000000e+00> : vector<8xf32>
    %27 = vector.multi_reduction <add>, %26, %cst_11 [1] : vector<8x8xf32> to vector<8xf32>
    %28 = vector.shape_cast %27 : vector<8xf32> to vector<8x1xf32>
    %29 = tpu.reciprocal %28 {approx = true} : vector<8x1xf32> -> vector<8x1xf32>
    %30 = vector.broadcast %29 : vector<8x1xf32> to vector<8x8xf32>
    %31 = arith.mulf %26, %30 : vector<8x8xf32>
    %32 = arith.truncf %31 : vector<8x8xf32> to vector<8x8xbf16>
    %c0_12 = arith.constant 0 : index
    %c0_13 = arith.constant 0 : index
    %33 = vector.load %arg13[%c0_12, %c0_13] : memref<8x32xbf16, #tpu.memory_space<vmem>>, vector<8x32xbf16>
    %cst_14 = arith.constant dense<0.000000e+00> : vector<8x32xf32>
    %34 = tpu.matmul %32, %33, %cst_14 {dimension_numbers = #tpu.dot_dimension_numbers<[1], [0], [0], [1], [0, 0, 1, 1], [], []>} : vector<8x8xbf16>, vector<8x32xbf16>, vector<8x32xf32> -> vector<8x32xf32>
    %c0_15 = arith.constant 0 : index
    %c0_16 = arith.constant 0 : index
    %c0_17 = arith.constant 0 : index
    %35 = vector.load %arg10[%c0_15, %c0_16, %c0_17] : memref<1x8x32xf32, #tpu.memory_space<vmem>>, vector<1x8x32xf32>
    %36 = vector.shape_cast %35 : vector<1x8x32xf32> to vector<8x32xf32>
    %37 = vector.shape_cast %34 : vector<8x32xf32> to vector<1x8x32xf32>
    tpu.vector_store %arg10[%c0_15, %c0_16, %c0_17], %37 {strides = array<i32>} : memref<1x8x32xf32, #tpu.memory_space<vmem>>, vector<1x8x32xf32>,
    %c0_18 = arith.constant 0 : index
    %c0_19 = arith.constant 0 : index
    %c0_20 = arith.constant 0 : index
    %38 = vector.load %arg11[%c0_18, %c0_19, %c0_20] : memref<1x8x8xf32, #tpu.memory_space<vmem>>, vector<1x8x8xf32>
    %39 = vector.shape_cast %38 : vector<1x8x8xf32> to vector<8x8xf32>
    %40 = vector.shape_cast %31 : vector<8x8xf32> to vector<1x8x8xf32>
    tpu.vector_store %arg11[%c0_18, %c0_19, %c0_20], %40 {strides = array<i32>} : memref<1x8x8xf32, #tpu.memory_space<vmem>>, vector<1x8x8xf32>,
    return
  }
  func.func @transform_0(%arg0: i32, %arg1: i32, %arg2: i32) -> (i32, i32, i32) {
    %c0_i32 = arith.constant 0 : i32
    %c0_i32_0 = arith.constant 0 : i32
    %c0_i32_1 = arith.constant 0 : i32
    return %arg0, %c0_i32, %c0_i32_0 : i32, i32, i32
  }
  func.func @transform_1(%arg0: i32, %arg1: i32, %arg2: i32) -> (i32, i32) {
    %c0_i32 = arith.constant 0 : i32
    %c0_i32_0 = arith.constant 0 : i32
    %c0_i32_1 = arith.constant 0 : i32
    return %c0_i32, %c0_i32_0 : i32, i32
  }
  func.func @transform_2(%arg0: i32, %arg1: i32, %arg2: i32) -> (i32, i32) {
    %c0_i32 = arith.constant 0 : i32
    %c0_i32_0 = arith.constant 0 : i32
    %c0_i32_1 = arith.constant 0 : i32
    return %c0_i32, %c0_i32_0 : i32, i32
  }
  func.func @transform_3(%arg0: i32, %arg1: i32, %arg2: i32) -> (i32, i32) {
    %c0_i32 = arith.constant 0 : i32
    %c0_i32_0 = arith.constant 0 : i32
    %c0_i32_1 = arith.constant 0 : i32
    return %c0_i32, %c0_i32_0 : i32, i32
  }
  func.func @transform_4(%arg0: i32, %arg1: i32, %arg2: i32) -> (i32, i32) {
    %c0_i32 = arith.constant 0 : i32
    %c0_i32_0 = arith.constant 0 : i32
    %c0_i32_1 = arith.constant 0 : i32
    return %c0_i32, %c0_i32_0 : i32, i32
  }
  func.func @transform_5(%arg0: i32, %arg1: i32, %arg2: i32) -> (i32, i32) {
    %c0_i32 = arith.constant 0 : i32
    %c0_i32_0 = arith.constant 0 : i32
    %c0_i32_1 = arith.constant 0 : i32
    return %c0_i32, %c0_i32_0 : i32, i32
  }
  func.func @transform_6(%arg0: i32, %arg1: i32, %arg2: i32) -> (i32, i32) {
    %c0_i32 = arith.constant 0 : i32
    %c0_i32_0 = arith.constant 0 : i32
    %c0_i32_1 = arith.constant 0 : i32
    return %c0_i32, %c0_i32_0 : i32, i32
  }
  func.func @transform_7(%arg0: i32, %arg1: i32, %arg2: i32) -> (i32, i32, i32) {
    %c1_i32 = arith.constant 1 : i32
    %0 = arith.muli %arg1, %c1_i32 : i32
    %1 = arith.addi %0, %arg2 : i32
    %c0_i32 = arith.constant 0 : i32
    %c0_i32_0 = arith.constant 0 : i32
    return %arg0, %1, %c0_i32 : i32, i32, i32
  }
  func.func @transform_8(%arg0: i32, %arg1: i32, %arg2: i32) -> (i32, i32, i32) {
    %c1_i32 = arith.constant 1 : i32
    %0 = arith.muli %arg1, %c1_i32 : i32
    %1 = arith.addi %0, %arg2 : i32
    %c0_i32 = arith.constant 0 : i32
    %c0_i32_0 = arith.constant 0 : i32
    return %arg0, %1, %c0_i32 : i32, i32, i32
  }
}

</mosaic_0001>

<bundles_post_ra>
// kernel: tpu_custom_call.1
= control target key start
LH: loop header
LB: loop body
LE: loop exit
PB: predicated region body
PF: predicated region fallthrough
CT: control target
= control target key end

     0   :  { %s1588_s0 = inlined_call_operand.hbm [shape: f32[2,8,16], index: 0, kind: input, shape index: {}]   ;;  %s1589_s1 = inlined_call_operand.hbm [shape: f32[16,32], index: 1, kind: input, shape index: {}]   ;;  %s1590_s2 = inlined_call_operand.vmem [shape: f32[1,32], index: 2, kind: input, shape index: {}]   ;;  %s1591_s3 = inlined_call_operand.hbm [shape: f32[16,32], index: 3, kind: input, shape index: {}]   ;;  %s1592_s4 = inlined_call_operand.vmem [shape: f32[1,32], index: 4, kind: input, shape index: {}]   ;;  %s1593_s5 = inlined_call_operand.vmem [shape: f32[16,32], index: 5, kind: input, shape index: {}]   ;;  %s1594_s6 = inlined_call_operand.vmem [shape: f32[1,32], index: 6, kind: input, shape index: {}]   ;;  %s1595_s7 = inlined_call_operand.hbm [shape: f32[2,8,32], index: 7, kind: output, shape index: {0}]   ;;  %s1596_s8 = inlined_call_operand.hbm [shape: f32[2,8,8], index: 8, kind: output, shape index: {1}]  }
   0x1   :  { %1604 = sst [smem:[#allocation19_spill]] %s1595_s7 }
   0x2   :  { %14 = vsyncpa [#allocation5], 0 }
   0x3   :  { %16 = vsyncpa [#allocation5 + $0x1], 0 }
   0x4   :  { %17 = vsyncpa [#allocation8], 0 }
   0x5   :  { %18 = vsyncpa [#allocation6], 0 }
   0x6   :  { %20 = vsyncpa [#allocation6 + $0x1], 0 }
   0x7   :  { %21 = vsyncpa [#allocation12], 0 }
   0x8   :  { %23 = vsyncpa [#allocation12 + $0x1], 0  ;;  %s1277_s27 = smov 0   ;;  %s1279_s28 = smov 0  }
   0x9   :  { %s1281_s29 = smov 0   ;;  %s1283_s30 = smov 0  }
   0xa   :  { %s1285_s9 = smov 0   ;;  %s1287_s10 = smov 0  }
   0xb LB: > { %1605 = sst [smem:[#allocation17_spill]] %s1201_s27  ;;  %s853_s11 = sadd.s32 4294967295, %s1221_s10   ;;  %s1221_s10 = sphi %s1287_s10, %s29_s10   ;;  %s1217_s9 = sphi %s1285_s9, %s1627_s9   ;;  %s1213_s30 = sphi %s1283_s30, %s1626_s30   ;;  %s1209_s29 = sphi %s1281_s29, %s1625_s29   ;;  %s1205_s28 = sphi %s1279_s28, %s1624_s28   ;;  %s1201_s27 = sphi %s1277_s27, %s1623_s27  }
   0xc   : > { %s854_s12 = sadd.s32 4294967294, %s1221_s10   ;;  %p68_p0 = scmp.ne.s32.totalorder %s1205_s28, %s1201_s27 }
   0xd   : > { %p1311_p1 = scmp.eq.s32.totalorder %s853_s11, 0  ;;  %p1315_p2 = scmp.eq.s32.totalorder %s853_s11, 1 }
   0xe   : > { %p228_p3 = scmp.eq.s32.totalorder %s854_s12, 1  ;;  %p855_p5 = scmp.ge.s32.totalorder %s1221_s10, 1 }
   0xf   : > { %s1606_s13 = scalar_select %p1311_p1, 1, 0 }
  0x10   : > { %p1321_p4 = por %p1311_p1, %p68_p0  ;;  %p1326_p6 = por %p228_p3, %p68_p0 }
  0x11   : > { %p265_p7 = scmp.lt.s32.totalorder %s1221_s10, 3  ;;  %s1223_s18 = smov [#allocation7]  }
  0x12   : > { %s1608_s15 = scalar_select %p1321_p4, 1, 0 }
  0x13   : > { %s1609_s16 = scalar_select %p1326_p6, 1, 0 }
  0x14   : > { %p1331_p8 = pnand %p855_p5, %p265_p7  ;;  %s277_s19 = sshll.u32 %s1223_s18, 4  ;;  %s1335_s19 = int_to_ptr.vmem [resolvable:$true] %s277_s19 }
  0x15   : > { %1610 = sst [smem:[#allocation18_spill]] %s1609_s16  ;;  %s1224_s21 = smov [#allocation9]  }
  0x16   : > { %p935_p9 = pneg %p1331_p8  ;;  %s293_s22 = sshll.u32 %s1224_s21, 4  ;;  %s1346_s22 = int_to_ptr.vmem [resolvable:$true] %s293_s22 }
  0x17   : > { %s1017_s25 = scalar_lea.hbm %s1589_s1, 256 }
  0x18   : > { %p1342_p11 = pnand %p935_p9, %p1311_p1  ;;  %p1018_p12 = scmp.ne.s32.totalorder %s1589_s1, %s1017_s25 }
  0x19   : > { %p1024_p5 = scmp.lt.u32.totalorder %s1017_s25, %s1589_s1 }
  0x1a   : > { %p1019_p13 = pneg %p1342_p11 }
  0x1c   : > { %p1020_p0 = pnand %p1019_p13, %p1018_p12 }
  0x1e   : > { %p1021_p3 = pneg %p1020_p0 }
  0x20   : > { %p1026_p7 = pnand %p1024_p5, %p1021_p3 }
  0x22   : > { %1029 = shalt.err (!%p1026_p7)
}
  0x23   : > { %s1030_s21 = scalar_lea.vmem %s1335_s19, 256  ;;  %p1038_p1 = scmp.lt.s32.totalorder %s1335_s19, %s1335_s19 }
  0x24   : > { %p1031_p9 = scmp.ne.s32.totalorder %s1335_s19, %s1030_s21  ;;  %p1039_p12 = scmp.lt.s32.totalorder %s1030_s21, %s1030_s21 }
  0x26   : > { %p1033_p10 = pnand %p1031_p9, %p1019_p13  ;;  %p1040_p0 = por %p1039_p12, %p1038_p1 }
  0x28   : > { %p1034_p6 = pneg %p1033_p10 }
  0x2a   : > { %p1041_p4 = pnand %p1040_p0, %p1034_p6 }
  0x2c   : > { %1044 = shalt.err (!%p1041_p4)
}
  0x2d   : > { %s1225_s23 = smov 128   ;;  %s1226_s24 = smov 8  }
  0x2e   : > { %938 = dma.hbm_to_vmem [thread:$0]  (!%p1342_p11), %s1589_s1, 256, %s1335_s19, [#allocation8], %s1225_s23, %s1225_s23, %s1226_s24  }
  0x2f   : > { %s1045_s18 = scalar_lea.hbm %s1591_s3, 256 }
  0x30   : > { %p1046_p1 = scmp.ne.s32.totalorder %s1591_s3, %s1045_s18  ;;  %p1052_p10 = scmp.lt.u32.totalorder %s1045_s18, %s1591_s3 }
  0x32   : > { %p1048_p4 = pnand %p1046_p1, %p1019_p13 }
  0x34   : > { %p1049_p6 = pneg %p1048_p4 }
  0x36   : > { %p1054_p3 = pnand %p1052_p10, %p1049_p6 }
  0x38   : > { %1057 = shalt.err (!%p1054_p3)
}
  0x39   : > { %s1058_s19 = scalar_lea.vmem %s1346_s22, 256  ;;  %p1066_p12 = scmp.lt.s32.totalorder %s1346_s22, %s1346_s22 }
  0x3a   : > { %p1059_p5 = scmp.ne.s32.totalorder %s1346_s22, %s1058_s19  ;;  %p1067_p0 = scmp.lt.s32.totalorder %s1058_s19, %s1058_s19 }
  0x3c   : > { %p1061_p7 = pnand %p1059_p5, %p1019_p13  ;;  %p1068_p1 = por %p1067_p0, %p1066_p12 }
  0x3e   : > { %p1062_p9 = pneg %p1061_p7 }
  0x40   : > { %p1069_p4 = pnand %p1068_p1, %p1062_p9 }
  0x42   : > { %1072 = shalt.err (!%p1069_p4)
}
  0x43   : > { %941 = dma.hbm_to_vmem [thread:$0]  (!%p1342_p11), %s1591_s3, 256, %s1346_s22, [#allocation8], %s1225_s23, %s1225_s23, %s1226_s24  }
  0x44   : > { %s48_s16 = sadd.s32 1, %s1217_s9  ;;  %s55_s25 = sadd.s32 1, %s1209_s29 }
  0x45   : > { %p50_p13 = scmp.ge.s32.totalorder %s48_s16, 2  ;;  %p62_p6 = scmp.ne.s32.totalorder %s1209_s29, %s1205_s28 }
  0x46   : > { %p63_p10 = scmp.eq.s32.totalorder %s1221_s10, 0  ;;  %p955_p3 = scmp.lt.s32.totalorder %s1221_s10, 2 }
  0x47   : > { %s1629_s16 = smov (%p50_p13, %s48_s16), 0  ;;  %p1410_p7 = por %p1315_p2, %p62_p6 }
  0x48   : > { %p64_p5 = por %p63_p10, %p62_p6  ;;  %s52_s26 = ssub.s32 %s1217_s9, %s1629_s16 }
  0x49   : > { %s1613_s20 = scalar_select %p1410_p7, 1, 0 }
  0x4a   : > { %s316_s11 = sand.u32 1, %s1209_s29   ;;  %p53_p9 = scmp.eq.s32.totalorder %s52_s26, 0 }
  0x4b   : > { %s859_s22 = sshll.u32 %s316_s11, 3  ;;  %s860_s23 = sshll.u32 %s1217_s9, 7 }
  0x4c   : > { %s1419_s24 = scalar_select %p53_p9, %s1209_s29, %s55_s25  }
  0x4d   : > { %s1424_s21 = scalar_lea.hbm %s1588_s0, %s860_s23  ;;  %s320_s14 = scalar_lea.vmem [#allocation4], %s859_s22 }
  0x4e   : > { %s327_s19 = sshll.u32 %s320_s14, 4  ;;  %p1428_p2 = pnand %p955_p3, %p64_p5  ;;  %s1432_s19 = int_to_ptr.vmem [resolvable:$true] %s327_s19 }
  0x4f   : > { %s317_s27 = scalar_lea.sflag [#allocation5], %s316_s11  ;;  %s1073_s25 = scalar_lea.hbm %s1424_s21, 128 }
  0x50   : > { %p1074_p11 = scmp.ne.s32.totalorder %s1424_s21, %s1073_s25  ;;  %p1075_p12 = pneg %p1428_p2 }
  0x51   : > { %s1078_s23 = scalar_lea.hbm %s1588_s0, 256  ;;  %p1079_p4 = scmp.lt.u32.totalorder %s1424_s21, %s1588_s0 }
  0x52   : > { %p1076_p0 = pnand %p1075_p12, %p1074_p11  ;;  %p1080_p13 = scmp.lt.u32.totalorder %s1078_s23, %s1073_s25 }
  0x53   : > { %p1082_p10 = scmp.lt.u32.totalorder %s1073_s25, %s1424_s21 }
  0x54   : > { %p1077_p1 = pneg %p1076_p0  ;;  %p1081_p6 = por %p1080_p13, %p1079_p4 }
  0x56   : > { %p1083_p3 = por %p1082_p10, %p1081_p6 }
  0x58   : > { %p1084_p5 = pnand %p1083_p3, %p1077_p1 }
  0x5a   : > { %1087 = shalt.err (!%p1084_p5)
}
  0x5b   : > { %s1088_s11 = scalar_lea.vmem %s1432_s19, 128  ;;  %s1227_s14 = smov [#allocation4]  }
  0x5c   : > { %p1089_p9 = scmp.ne.s32.totalorder %s1432_s19, %s1088_s11  ;;  %s1093_s26 = sshll.u32 %s1227_s14, 4  ;;  %s1094_s26 = int_to_ptr.vmem [resolvable:$false] %s1093_s26 }
  0x5d   : > { %s1095_s22 = scalar_lea.vmem %s1094_s26, 256  ;;  %p1096_p7 = scmp.lt.s32.totalorder %s1432_s19, %s1094_s26 }
  0x5e   : > { %p1091_p11 = pnand %p1089_p9, %p1075_p12  ;;  %p1097_p4 = scmp.lt.s32.totalorder %s1095_s22, %s1088_s11 }
  0x60   : > { %p1092_p0 = pneg %p1091_p11  ;;  %p1098_p13 = por %p1097_p4, %p1096_p7 }
  0x62   : > { %p1099_p6 = pnand %p1098_p13, %p1092_p0 }
  0x64   : > { %1102 = shalt.err (!%p1099_p6)
}
  0x65   : > { %945 = dma.hbm_to_vmem [thread:$0]  (!%p1428_p2), %s1424_s21, 128, %s1432_s19, %s317_s27  }
  0x66   : > { %336 = sbr.rel (%p1331_p8) target bundleno = 1106 (0x452), region = 48  ;;  %s1462_s25 = sand.u32 (!%p1331_p8), 1, %s1205_s28  }
  0x67   : > { %s1465_s23 = sshll.u32 (!%p1331_p8), %s1462_s25, 3  ;;  %s339_s12 = scalar_lea.sflag (!%p1331_p8), [#allocation5], %s1462_s25 }
  0x68   : > { %s342_s18 = scalar_lea.vmem (!%p1331_p8), [#allocation4], %s1465_s23  ;;  %p1615_p7 = scmp.ne.s32.totalorder (!%p1331_p8), %s1608_s15, 0 }
  0x6d   : > { %1184 = dma.done.wait (%p1615_p7), %s339_s12, 128  }
  0x6e   : > { %1186 = vsyncadd (%p1615_p7), %s339_s12, 4294967168  ;;  %p1616_p2 = scmp.ne.s32.totalorder %s1606_s13, 0 }
  0x70   : > { %1188 = dma.done.wait (%p1616_p2), [#allocation8], 512  }
  0x71   : > { %1190 = vsyncadd (%p1616_p2), [#allocation8], 4294966784  ;;  %v1228_v0 = vmov 0.0   ;;  %vm1229_vm0 = vmmov 0   ;;  %v397_v1 = vld [vmem:[#allocation9] sm:$0xff]  ;;  %v398_v2 = vld [vmem:[#allocation9 + $0x8] sm:$0xff] }
  0x72   : > { %891 = vmatprep.subr.bf16.mxu0 %v1228_v0  ;;  %893 = vmatprep.mubr.msk.bf16.mxu0 %vm1229_vm0, %v1228_v0  ;;  %v395_v3 = vld [vmem:[%s342_s18] sm:$0xff]  ;;  %v399_v4 = vpack.c.bf16 %v398_v2, %v397_v1  ;;  %v511_v5 = vld [vmem:[#allocation7] sm:$0xff]  ;;  %v512_v6 = vld [vmem:[#allocation7 + $0x8] sm:$0xff]  ;;  %vm407_vm1 = vcmask 130048   ;;  %vm502_vm2 = vcmask 257024   ;;  %vm568_vm3 = vcmask 261120  }
  0x73   : > { %897 = vmatprep.subr.bf16.mxu1 %v1228_v0  ;;  %899 = vmatprep.mubr.msk.bf16.mxu1 %vm1229_vm0, %v1228_v0  ;;  %v396_v7 = vpack.c.bf16 %v395_v3, %v395_v3  ;;  %v513_v8 = vpack.c.bf16 %v512_v6, %v511_v5  ;;  %v451_v9 = vld [vmem:[%s1593_s5] sm:$0xff]  ;;  %v452_v10 = vld [vmem:[%s1593_s5 + $0x8] sm:$0xff]  ;;  %vm632_vm4 = vcmask 1043456   ;;  %vm615_vm5 = vcmask 64512   ;;  %s387_s22 = scalar_lea.vmem [#allocation11], %s1465_s23  ;;  %s877_s12 = sshll.u32 %s1213_s30, 7 }
  0x74   : > { %892 = vmatpush3.bf16.msra.mxu0 %v399_v4  ;;  %v453_v11 = vpack.c.bf16 %v452_v10, %v451_v9  ;;  %v867_v12 = vld [vmem:[%s1592_s4] ss:$0 sm:$0xff]  ;;  %s1512_s15 = scalar_lea.hbm %s1596_s8, %s877_s12  ;;  %s714_s17 = sshll.u32 %s387_s22, 4  ;;  %s715_s17 = int_to_ptr.vmem [resolvable:$true] %s714_s17 }
  0x75   : > { %903 = vmatprep.subr.bf16.mxu0 %v1228_v0  ;;  %v871_v19 = vld [vmem:[%s1590_s2] ss:$0 sm:$0xff]  ;;  %s684_s21 = scalar_lea.sflag [#allocation12], %s1462_s25  ;;  %s1103_s19 = scalar_lea.vmem %s715_s17, 128 }
  0x76   : > { %898 = vmatpush3.bf16.msra.mxu1 %v453_v11  ;;  %v869_v29 = vld [vmem:[%s1594_s6] ss:$0 sm:$0xff]  ;;  %p1104_p8 = scmp.ne.s32.totalorder %s715_s17, %s1103_s19  ;;  %p1617_p12 = scmp.ne.s32.totalorder %s1613_s20, 0 }
  0x77   : > { %894 = vmatmul.mubr.msk.bf16.vlgmr.msra.gmra.mrb[0].mxu0 %vm407_vm1, %v396_v7  ;;  %909 = vmatprep.subr.bf16.mxu1 %v1228_v0  ;;  %s1230_s7 = smov [#allocation11]  }
  0x78   : > { %904 = vmatpush3.bf16.msra.mxu0 %v513_v8  ;;  %905 = vmatprep.mubr.msk.bf16.mxu0 %vm1229_vm0, %v1228_v0  ;;  %p1105_p1 = pnand %p1104_p8, %p1617_p12  ;;  %s1107_s27 = sshll.u32 %s1230_s7, 4  ;;  %s1108_s27 = int_to_ptr.vmem [resolvable:$false] %s1107_s27 }
  0x79   : > { %915 = vmatprep.subr.bf16.mxu0 %v1228_v0  ;;  %900 = vmatmul.mubr.msk.bf16.vlgmr.msra.gmra.mrb[0].mxu1 %vm407_vm1, %v396_v7  ;;  %s1109_s11 = scalar_lea.vmem %s1108_s27, 256  ;;  %p1110_p3 = scmp.lt.s32.totalorder %s715_s17, %s1108_s27 }
  0x7a   : > { %911 = vmatprep.mubr.msk.bf16.mxu1 %vm1229_vm0, %v1228_v0  ;;  %p1106_p10 = pneg %p1105_p1  ;;  %p1111_p5 = scmp.lt.s32.totalorder %s1109_s11, %s1103_s19 }
  0x7c   : > { %p1112_p9 = por %p1111_p5, %p1110_p3 }
  0x7e   : > { %p1113_p11 = pnand %p1112_p9, %p1106_p10 }
  0x7f   : > { %906 = vmatmul.mubr.msk.bf16.vlgmr.msra.gmra.mrb[4].mxu0 %vm407_vm1, %v396_v7 }
  0x80   : > { %917 = vmatprep.mubr.msk.bf16.mxu0 %vm1229_vm0, %v1228_v0 }
 0x14a   : > { %v445_v13 = vpop.f32.mrb[0].mxu0 }
 0x14b   : > { %v446_v14 = vadd.f32 %v867_v12, %v445_v13  ;;  %v895_v15 = vpop.f32.mrb[1].mxu0 }
 0x14c   : > { %v448_v16 = vpop.f32.mrb[2].mxu0  ;;  %v495_v30 = vpop.f32.mrb[0].mxu1 }
 0x14d   : > { %v501_v17 = vpack.c.bf16 %v446_v14, %v446_v14  ;;  %v896_v18 = vpop.f32.mrb[3].mxu0  ;;  %v496_v31 = vadd.f32 %v869_v29, %v495_v30  ;;  %v901_v32 = vpop.f32.mrb[1].mxu1 }
 0x14e   : > { %v498_v33 = vpop.f32.mrb[2].mxu1 }
 0x14f   : > { %503 = vst.msk [vmem:[#allocation2] sm:$0xf] %vm502_vm2, %v501_v17  ;;  %v504_v34 = vpack.c.bf16 %v496_v31, %v496_v31  ;;  %v902_v35 = vpop.f32.mrb[3].mxu1 }
 0x151   : > { %505 = vst.msk [vmem:[#allocation3] sm:$0xf] %vm502_vm2, %v504_v34 }
 0x152   : > { %v559_v20 = vpop.f32.mrb[4].mxu0 }
 0x153   : > { %v560_v21 = vadd.f32 %v871_v19, %v559_v20  ;;  %v907_v22 = vpop.f32.mrb[5].mxu0 }
 0x154   : > { %v562_v23 = vpop.f32.mrb[6].mxu0 }
 0x155   : > { %v908_v24 = vpop.f32.mrb[7].mxu0  ;;  %v565_v26 = vmul.f32 0.17677669, %v560_v21 }
 0x156   : > { %v567_v25 = vld [vmem:[#allocation2] sm:$0xf] }
 0x157   : > { %v573_v27 = vsel %vm568_vm3, %v567_v25, 0  ;;  %v566_v28 = vpack.c.bf16 %v565_v26, %v565_v26 }
 0x158   : > { %910 = vmatpush3.bf16.xpose.msra.mxu1 %v573_v27  ;;  %v628_v36 = vld [vmem:[#allocation3] sm:$0xf] }
 0x159   : > { %v634_v37 = vsel %vm632_vm4, %v628_v36, 0 }
 0x15a   : > { %916 = vmatpush3.bf16.msra.mxu0 %v634_v37 }
 0x15f   : > { %912 = vmatmul.mubr.msk.bf16.vlgmr.msra.gmra.mrb[4].mxu1 %vm568_vm3, %v566_v28 }
 0x232   : > { %v609_v38 = vpop.f32.mrb[4].mxu1 }
 0x233   : > { %v913_v39 = vpop.f32.mrb[5].mxu1  ;;  %v616_v40 = vsel %vm615_vm5, %v609_v38, -inf }
 0x234   : > { %617 = vmax.xlane.f32.xlu0 %v616_v40  ;;  %v612_v41 = vpop.f32.mrb[6].mxu1 }
 0x235   : > { %v914_v42 = vpop.f32.mrb[7].mxu1 }
 0x2c1   : > { %v618_v43 = vpop.xlane.xlu0 %617 }
 0x2c2   : > { %v619_v44 = vsub.f32 %v609_v38, %v618_v43 }
 0x2c4   : > { %v620_v45 = vmul.f32 1.442695, %v619_v44 }
 0x2c6   : > { %1013 = vpow2.f32 %v620_v45 }
 0x2d0   : > { %v1014_v46 = vpop.eup %1013 }
 0x2d1   : > { %v622_v47 = vsel %vm615_vm5, %v1014_v46, 0.0 }
 0x2d2   : > { %623 = vadd.xlane.f32.xlu0 %v622_v47 }
 0x35f   : > { %v624_v48 = vpop.xlane.xlu0 %623 }
 0x360   : > { %1015 = vrcp.f32 %v624_v48 }
 0x36a   : > { %v1016_v49 = vpop.eup %1015 }
 0x36b   : > { %v626_v50 = vmul.f32 %v1016_v49, %v1014_v46 }
 0x36d   : > { %v627_v51 = vpack.c.bf16 %v626_v50, %v626_v50  ;;  %677 = vst.msk [vmem:[%s387_s22] sm:$0xff] %vm615_vm5, %v626_v50 }
 0x36f   : > { %918 = vmatmul.mubr.msk.bf16.vlgmr.msra.gmra.mrb[8].mxu0 %vm615_vm5, %v627_v51 }
 0x370   : > { %1116 = shalt.err (!%p1113_p11)
}
 0x371   : > { %s1117_s14 = scalar_lea.hbm %s1512_s15, 128  ;;  %s1121_s18 = scalar_lea.hbm %s1596_s8, 256 }
 0x372   : > { %p1118_p0 = scmp.ne.s32.totalorder %s1512_s15, %s1117_s14  ;;  %p1122_p6 = scmp.lt.u32.totalorder %s1512_s15, %s1596_s8 }
 0x373   : > { %p1123_p7 = scmp.lt.u32.totalorder %s1121_s18, %s1117_s14  ;;  %p1125_p8 = scmp.lt.u32.totalorder %s1117_s14, %s1512_s15 }
 0x374   : > { %p1119_p4 = pnand %p1118_p0, %p1617_p12 }
 0x375   : > { %p1124_p2 = por %p1123_p7, %p1122_p6 }
 0x376   : > { %p1120_p13 = pneg %p1119_p4 }
 0x377   : > { %p1126_p1 = por %p1125_p8, %p1124_p2 }
 0x379   : > { %p1127_p10 = pnand %p1126_p1, %p1120_p13 }
 0x37b   : > { %1130 = shalt.err (!%p1127_p10)
}
 0x37c   : > { %932 = dma.vmem_to_hbm [thread:$0]  (%p1617_p12), %s715_s17, 128, %s1512_s15, %s684_s21  }
 0x37d   : > { %s380_s19 = scalar_lea.vmem [#allocation10], %s1465_s23  ;;  %s1618_s22 = sld [smem:[#allocation19_spill]] }
 0x37e   : > { %s699_s27 = sshll.u32 %s380_s19, 4  ;;  %s679_s14 = scalar_lea.sflag [#allocation6], %s1462_s25  ;;  %s1540_s27 = int_to_ptr.vmem [resolvable:$true] %s699_s27 }
 0x37f   : > { %s1131_s15 = scalar_lea.vmem %s1540_s27, 128  ;;  %s1231_s30 = smov [#allocation10]  }
 0x380   : > { %p1132_p3 = scmp.ne.s32.totalorder %s1540_s27, %s1131_s15  ;;  %s1135_s23 = sshll.u32 %s1231_s30, 4  ;;  %s1136_s23 = int_to_ptr.vmem [resolvable:$false] %s1135_s23 }
 0x381   : > { %p1138_p11 = scmp.lt.s32.totalorder %s1540_s27, %s1136_s23 }
 0x382   : > { %p1133_p5 = pnand %p1132_p3, %p1617_p12 }
 0x383   : > { %s1538_s18 = scalar_lea.hbm %s1618_s22, %s877_s12  ;;  %s1137_s12 = scalar_lea.vmem %s1136_s23, 256 }
 0x384   : > { %p1134_p9 = pneg %p1133_p5  ;;  %p1139_p0 = scmp.lt.s32.totalorder %s1137_s12, %s1131_s15 }
 0x386   : > { %p1140_p4 = por %p1139_p0, %p1138_p11 }
 0x388   : > { %p1141_p13 = pnand %p1140_p4, %p1134_p9 }
 0x442   : > { %v670_v52 = vpop.f32.mrb[8].mxu0 }
 0x443   : > { %676 = vst.msk [vmem:[%s380_s19] sm:$0xff] %vm568_vm3, %v670_v52  ;;  %v919_v53 = vpop.f32.mrb[9].mxu0 }
 0x444   : > { %v673_v54 = vpop.f32.mrb[10].mxu0 }
 0x445   : > { %1144 = shalt.err (!%p1141_p13)
}
 0x446   : > { %s1145_s25 = scalar_lea.hbm %s1538_s18, 128  ;;  %s1149_s13 = scalar_lea.hbm %s1618_s22, 256 }
 0x447   : > { %p1146_p6 = scmp.ne.s32.totalorder %s1538_s18, %s1145_s25  ;;  %p1150_p8 = scmp.lt.u32.totalorder %s1538_s18, %s1618_s22 }
 0x448   : > { %p1151_p1 = scmp.lt.u32.totalorder %s1149_s13, %s1145_s25  ;;  %p1153_p3 = scmp.lt.u32.totalorder %s1145_s25, %s1538_s18 }
 0x449   : > { %p1147_p7 = pnand %p1146_p6, %p1617_p12 }
 0x44a   : > { %p1152_p10 = por %p1151_p1, %p1150_p8 }
 0x44b   : > { %p1148_p2 = pneg %p1147_p7 }
 0x44c   : > { %p1154_p5 = por %p1153_p3, %p1152_p10 }
 0x44e   : > { %p1155_p9 = pnand %p1154_p5, %p1148_p2 }
 0x450   : > { %1158 = shalt.err (!%p1155_p9)
}
 0x451   : > { %931 = dma.vmem_to_hbm [thread:$0]  (%p1617_p12), %s1540_s27, 128, %s1538_s18, %s679_s14   ;;  %v920_v55 = vpop.f32.mrb[11].mxu0 }
 0x452 PF: > { %s1619_s11 = sld [smem:[#allocation17_spill]]  ;;  %s1620_s26 = sld [smem:[#allocation18_spill]] }
 0x453   : > { %p1622_p0 = scmp.ge.s32.totalorder %s1221_s10, 2 }
 0x458   : > { %s726_s15 = sand.u32 1, %s1619_s11   ;;  %p1621_p11 = scmp.ne.s32.totalorder %s1620_s26, 0 }
 0x459   : > { %s727_s30 = scalar_lea.sflag [#allocation6], %s726_s15 }
 0x45a   : > { %p947_p4 = pnand %p1622_p0, %p1621_p11 }
 0x45c   : > { %1192 = dma.done.wait (!%p947_p4), %s727_s30, 128  }
 0x45d   : > { %1194 = vsyncadd (!%p947_p4), %s727_s30, 4294967168  ;;  %s736_s23 = scalar_lea.sflag [#allocation12], %s726_s15 }
 0x45e   : > { %1196 = dma.done.wait (!%p947_p4), %s736_s23, 128  }
 0x45f   : > { %1198 = vsyncadd (!%p947_p4), %s736_s23, 4294967168  ;;  %s29_s10 = sadd.s32 1, %s1221_s10   ;;  %s1623_s27 = smov %s1205_s28 }
 0x460   : > { %p26_p13 = scmp.ge.s32.totalorder %s29_s10, 4   ;;  %s1624_s28 = smov %s1209_s29 }
 0x461   : > { %s1625_s29 = smov %s1419_s24  ;;  %s1626_s30 = smov %s1217_s9 }
 0x462   : > { %s1627_s9 = smov %s1629_s16  ;;  %28 = sbr.rel (!%p26_p13) target bundleno = 11 (0xb), region = 123 }
 0x469   :  { %741 = vsyncpa [#allocation5], 1 }
 0x46a   :  { %743 = vsyncpa [#allocation5 + $0x1], 1 }
 0x46b   :  { %744 = vsyncpa [#allocation8], 1 }
 0x46c   :  { %745 = vsyncpa [#allocation6], 1 }
 0x46d   :  { %747 = vsyncpa [#allocation6 + $0x1], 1 }
 0x46e   :  { %748 = vsyncpa [#allocation12], 1 }
 0x46f   :  { %750 = vsyncpa [#allocation12 + $0x1], 1 }

</bundles_post_ra>
